<compile_context>
chip_gen: v7x
topology: tpu7x:2x2x1
jax: 0.10.0
libtpu: 0.0.40
codegen_flags: <defaults>
</compile_context>

<pallas_src>
import functools
import math

import jax
import jax.numpy as jnp
from jax.experimental import pallas as pl
from jax.experimental.pallas import tpu as pltpu


ROW_TILE = 512                    # max node-row tile
EDGE_TILE = 256                   # max edge-row tile
LANES = 128                       # lane-dense output width
VMEM_LIMIT = 32 * 1024 * 1024     # v7x-safe; real per-call footprint << 16 MiB


def _round_up(x, m):
    return ((x + m - 1) // m) * m


def _tiling(rows, max_tile, align=8, want_steps=2):
    """Pick (tile, padded_rows, grid_steps).

    Avoids padding small inputs up to a full max_tile, and (when the input is
    big enough) guarantees >= 2 grid steps so both v7x TensorCores get work.
    """
    rows = max(int(rows), 1)
    tile = min(max_tile, _round_up(rows, align))
    padded = _round_up(rows, tile)
    steps = padded // tile
    if steps < want_steps and tile >= 2 * align:
        tile = _round_up(tile // 2, align)
        padded = _round_up(rows, tile)
        steps = padded // tile
    return tile, padded, steps


def _pad_rows(a, target_rows):
    pad = target_rows - a.shape[0]
    if pad <= 0:
        return a
    return jnp.concatenate([a, jnp.zeros((pad,) + a.shape[1:], a.dtype)], axis=0)


def _pad_cols(a, target_cols):
    pad = target_cols - a.shape[-1]
    if pad <= 0:
        return a
    return jnp.concatenate(
        [a, jnp.zeros(a.shape[:-1] + (pad,), a.dtype)], axis=-1)


def _apply_act(y, act):
    if act == "relu":
        return jnp.maximum(y, 0.0)
    if act == "elu":
        return jnp.where(y > 0.0, y, jnp.exp(jnp.minimum(y, 0.0)) - 1.0)
    return y


# ----------------------------------------------------------------------------
# Pallas kernels
# ----------------------------------------------------------------------------
def _fused_linear_kernel(*refs, n_terms, has_bias, has_add, act):
    # out = act(sum_i a_i @ b_i [+ bias] [+ add]); everything f32 (tiny K).
    acc = None
    for t in range(n_terms):
        y = jnp.dot(refs[2 * t][...], refs[2 * t + 1][...],
                    preferred_element_type=jnp.float32)
        acc = y if acc is None else acc + y
    idx = 2 * n_terms
    if has_bias:
        acc = acc + refs[idx][...]
        idx += 1
    if has_add:
        acc = acc + refs[idx][...]
        idx += 1
    refs[idx][...] = _apply_act(acc, act)


def fused_linear(terms, bias=None, add=None, act="none", max_tile=ROW_TILE):
    """Row-tiled fused sum_i(a_i @ b_i) [+ bias] [+ add] [+ activation].

    All b_i / bias / add share the same (lane-dense, padded-to-128) output
    width, so the kernel's stores are unmasked full-lane vector stores.
    """
    m = terms[0][0].shape[0]
    n = terms[0][1].shape[1]
    tile, m_pad, steps = _tiling(m, max_tile)

    inputs, in_specs = [], []
    for a, b in terms:
        k = a.shape[1]
        inputs.append(_pad_rows(a.astype(jnp.float32), m_pad))
        in_specs.append(pl.BlockSpec((tile, k), lambda i: (i, 0)))
        inputs.append(b)
        in_specs.append(pl.BlockSpec(b.shape, lambda i: (0, 0)))
    if bias is not None:
        inputs.append(bias)
        in_specs.append(pl.BlockSpec(bias.shape, lambda i: (0, 0)))
    if add is not None:
        inputs.append(_pad_rows(add.astype(jnp.float32), m_pad))
        in_specs.append(pl.BlockSpec((tile, n), lambda i: (i, 0)))

    out = pl.pallas_call(
        functools.partial(_fused_linear_kernel, n_terms=len(terms),
                          has_bias=bias is not None, has_add=add is not None,
                          act=act),
        out_shape=jax.ShapeDtypeStruct((m_pad, n), jnp.float32),
        grid=(steps,),
        in_specs=in_specs,
        out_specs=pl.BlockSpec((tile, n), lambda i: (i, 0)),
        compiler_params=pltpu.CompilerParams(
            dimension_semantics=("parallel",),
            vmem_limit_bytes=VMEM_LIMIT),
    )(*inputs)
    return out[:m]


def _nnconv_edge_kernel(ea_ref, xsrc_ref, w1_ref, b1_ref, w2_ref, b2_ref,
                        msg_ref):
    # Fused edge network + message contraction for one edge tile:
    #   h   = relu(edge_attr @ W1 + b1)                              (TE, 128)
    #   msg = x_src @ b2  +  P @ W2_flat
    # with P[e, k*128 + hh] = x_src[e, k] * h[e, hh]  (single long-K matmul:
    # no per-k MXU-result pops, no per-k VPU accumulation chain).
    h = jnp.dot(ea_ref[...], w1_ref[...], preferred_element_type=jnp.float32)
    h = jnp.maximum(h + b1_ref[...], 0.0)

    xsrc = xsrc_ref[...]                                   # f32 (TE, K)
    te, k_in = xsrc.shape
    acc = jnp.dot(xsrc, b2_ref[...], preferred_element_type=jnp.float32)

    p = (xsrc.astype(jnp.bfloat16)[:, :, None]
         * h.astype(jnp.bfloat16)[:, None, :]).reshape(te, k_in * 128)
    acc = acc + jnp.dot(p, w2_ref[...], preferred_element_type=jnp.float32)
    msg_ref[...] = acc                                     # (TE, 128) lane-dense


def nnconv_messages(edge_attr, x_src, p, max_tile=EDGE_TILE):
    """Per-edge NNConv messages: (E, 128) f32, feature cols >= O are zero."""
    e, de = edge_attr.shape
    k_in = x_src.shape[1]
    o_pad = p["w2_flat"].shape[1]            # 128
    tile, e_pad, steps = _tiling(e, max_tile)

    ea = _pad_rows(edge_attr.astype(jnp.float32), e_pad)
    xs = _pad_rows(x_src.astype(jnp.float32), e_pad)   # padded rows are 0 -> msg 0

    msg = pl.pallas_call(
        _nnconv_edge_kernel,
        out_shape=jax.ShapeDtypeStruct((e_pad, o_pad), jnp.float32),
        grid=(steps,),
        in_specs=[
            pl.BlockSpec((tile, de), lambda i: (i, 0)),
            pl.BlockSpec((tile, k_in), lambda i: (i, 0)),
            pl.BlockSpec(p["nn_w1"].shape, lambda i: (0, 0)),
            pl.BlockSpec(p["nn_b1"].shape, lambda i: (0, 0)),
            pl.BlockSpec(p["w2_flat"].shape, lambda i: (0, 0)),
            pl.BlockSpec(p["b2_mat"].shape, lambda i: (0, 0)),
        ],
        out_specs=pl.BlockSpec((tile, o_pad), lambda i: (i, 0)),
        compiler_params=pltpu.CompilerParams(
            dimension_semantics=("parallel",),
            vmem_limit_bytes=VMEM_LIMIT),
    )(ea, xs, p["nn_w1"], p["nn_b1"], p["w2_flat"], p["b2_mat"])
    return msg[:e]


def _fc_head_kernel(x_ref, w1_ref, b1_ref, w2_ref, b2_ref, w3_ref, b3_ref, o_ref):
    h = jnp.dot(x_ref[...], w1_ref[...], preferred_element_type=jnp.float32) + b1_ref[...]
    h = _apply_act(h, "elu")
    h = jnp.dot(h, w2_ref[...], preferred_element_type=jnp.float32) + b2_ref[...]
    h = _apply_act(h, "elu")
    o_ref[...] = jnp.dot(h, w3_ref[...], preferred_element_type=jnp.float32) + b3_ref[...]


def fc_head(xcat, p):
    """Fused fc1->ELU->fc2->ELU->fc3; intermediates never leave VMEM."""
    b_rows = xcat.shape[0]
    b_pad = _round_up(max(b_rows, 1), 8)
    xp = _pad_rows(xcat.astype(jnp.float32), b_pad)
    vspec = pl.BlockSpec(memory_space=pltpu.MemorySpace.VMEM)
    out = pl.pallas_call(
        _fc_head_kernel,
        out_shape=jax.ShapeDtypeStruct((b_pad, 1), jnp.float32),
        in_specs=[vspec] * 7,
        out_specs=vspec,
        compiler_params=pltpu.CompilerParams(vmem_limit_bytes=VMEM_LIMIT),
    )(xp,
      p["fc1_w"], p["fc1_b"].reshape(1, -1),
      p["fc2_w"], p["fc2_b"].reshape(1, -1),
      p["fc3_w"], p["fc3_b"].reshape(1, -1))
    return out[:b_rows]


# ----------------------------------------------------------------------------
# Graph glue (index-driven gather/scatter/pooling; O(E) / O(N) work in XLA)
# ----------------------------------------------------------------------------
def segment_mean(x, seg, num_segments):
    s = jax.ops.segment_sum(x, seg, num_segments=num_segments)
    c = jax.ops.segment_sum(jnp.ones((x.shape[0], 1), x.dtype), seg,
                            num_segments=num_segments)
    return s / jnp.maximum(c, 1.0)


def avg_pool(x, assignment_index, num_targets):
    # avg_pool(x, assign) == scatter_mean(x[assign[0]], assign[1])
    gathered = jnp.take(x, assignment_index[0], axis=0)
    return segment_mean(gathered, assignment_index[1], num_targets)


def nnconv_elu(x, edge_index, edge_attr, p):
    """ELU(NNConv(x, edge_index, edge_attr)), aggr='add'."""
    n = x.shape[0]
    src, dst = edge_index[0], edge_index[1]
    x_src = jnp.take(x, src, axis=0)                       # O(E) gather (glue)
    msg = nnconv_messages(edge_attr, x_src, p)             # fused Pallas edge kernel
    # TODO(synk): fuse this scatter-add into the edge kernel (dst-sorted edges
    # + PrefetchScalarGridSpec segment offsets) to remove the (E,128) HBM
    # round trip per layer.
    agg = jax.ops.segment_sum(msg, dst, num_segments=n)    # (N, 128) scatter-add
    # root transform + neighbor aggregate + bias + ELU in one fused kernel
    out = fused_linear([(x, p["root"])], bias=p["bias"], add=agg, act="elu")
    return out[:, :p["out_dim"]]


def graphconv_elu(x, edge_index, p):
    """ELU(GraphConv(x, edge_index)): out = x@W_root + (sum_j x_j)@W_nbr + b."""
    n = x.shape[0]
    src, dst = edge_index[0], edge_index[1]
    nbr = jax.ops.segment_sum(jnp.take(x, src, axis=0), dst, num_segments=n)
    # two accumulating dots in-kernel; no (N, 2K) concat materialized in HBM
    out = fused_linear([(x, p["w_root"]), (nbr, p["w_nbr"])],
                       bias=p["bias"], act="elu")
    return out[:, :p["out_dim"]]


# ----------------------------------------------------------------------------
# Parameter init (deterministic, mimics torch.nn.Linear uniform init)
# ----------------------------------------------------------------------------
def _linear_init(key, fan_in, fan_out):
    kw, kb = jax.random.split(key)
    bound = 1.0 / math.sqrt(fan_in)
    w = jax.random.uniform(kw, (fan_in, fan_out), jnp.float32, -bound, bound)
    b = jax.random.uniform(kb, (fan_out,), jnp.float32, -bound, bound)
    return w, b


def init_params(key, num_features, num_i_2, num_i_3, edge_attr_dim=5):
    keys = jax.random.split(key, 10)
    params = {"num_i_2": num_i_2, "num_i_3": num_i_3}

    def nnconv_params(k, m_in, m_out):
        k1, k2, k3 = jax.random.split(k, 3)
        nn_w1, nn_b1 = _linear_init(k1, edge_attr_dim, 128)
        nn_w2, nn_b2 = _linear_init(k2, 128, m_in * m_out)
        root, bias = _linear_init(k3, m_in, m_out)
        # Per-edge weight projection stored k-major and flattened so the
        # in-kernel contraction index is k*128 + h; output dim zero-padded to
        # 128 lanes (lane-dense stores) and the big operand pre-cast to bf16.
        w2_3d = nn_w2.reshape(128, m_in, m_out).transpose(1, 0, 2)   # (K,128,O)
        w2_flat = _pad_cols(w2_3d.reshape(m_in * 128, m_out), LANES)
        return dict(
            nn_w1=nn_w1,                                   # (De, 128) f32
            nn_b1=nn_b1.reshape(1, 128),                   # (1, 128)  f32
            w2_flat=w2_flat.astype(jnp.bfloat16),          # (K*128, 128) bf16
            b2_mat=_pad_cols(nn_b2.reshape(m_in, m_out), LANES),   # (K, 128)
            root=_pad_cols(root, LANES),                   # (K, 128)
            bias=_pad_cols(bias.reshape(1, m_out), LANES), # (1, 128)
            out_dim=m_out)

    def graphconv_params(k, m_in, m_out):
        k1, k2 = jax.random.split(k)
        w_nbr, bias = _linear_init(k1, m_in, m_out)
        w_root, _ = _linear_init(k2, m_in, m_out)
        return dict(
            w_root=_pad_cols(w_root, LANES),
            w_nbr=_pad_cols(w_nbr, LANES),
            bias=_pad_cols(bias.reshape(1, m_out), LANES),
            out_dim=m_out)

    params["conv1"] = nnconv_params(keys[0], num_features, 32)
    params["conv2"] = nnconv_params(keys[1], 32, 64)
    params["conv3"] = nnconv_params(keys[2], 64, 64)
    params["conv4"] = graphconv_params(keys[3], 64 + num_i_2, 64)
    params["conv5"] = graphconv_params(keys[4], 64, 64)
    params["conv6"] = graphconv_params(keys[5], 64 + num_i_3, 64)
    params["conv7"] = graphconv_params(keys[6], 64, 64)
    params["fc1_w"], params["fc1_b"] = _linear_init(keys[7], 3 * 64, 64)
    params["fc2_w"], params["fc2_b"] = _linear_init(keys[8], 64, 32)
    params["fc3_w"], params["fc3_b"] = _linear_init(keys[9], 32, 1)
    return params


# ----------------------------------------------------------------------------
# Full forward pass (mirrors k123_GNN.forward)
# ----------------------------------------------------------------------------
def k123_gnn_forward(params, data):
    num_graphs = data["num_graphs"]
    iso2 = jax.nn.one_hot(data["iso_type_2"], params["num_i_2"], dtype=jnp.float32)
    iso3 = jax.nn.one_hot(data["iso_type_3"], params["num_i_3"], dtype=jnp.float32)

    x = data["x"]
    x = nnconv_elu(x, data["edge_index"], data["edge_attr"], params["conv1"])
    x = nnconv_elu(x, data["edge_index"], data["edge_attr"], params["conv2"])
    x = nnconv_elu(x, data["edge_index"], data["edge_attr"], params["conv3"])

    x_1 = segment_mean(x, data["batch"], num_graphs)

    # 2-tuple branch
    x2 = avg_pool(x, data["assignment_index_2"], data["iso_type_2"].shape[0])
    x2 = jnp.concatenate([x2, iso2], axis=1)
    x2 = graphconv_elu(x2, data["edge_index_2"], params["conv4"])
    x2 = graphconv_elu(x2, data["edge_index_2"], params["conv5"])
    x_2 = segment_mean(x2, data["batch_2"], num_graphs)

    # 3-tuple branch
    x3 = avg_pool(x, data["assignment_index_3"], data["iso_type_3"].shape[0])
    x3 = jnp.concatenate([x3, iso3], axis=1)
    x3 = graphconv_elu(x3, data["edge_index_3"], params["conv6"])
    x3 = graphconv_elu(x3, data["edge_index_3"], params["conv7"])
    x_3 = segment_mean(x3, data["batch_3"], num_graphs)

    xcat = jnp.concatenate([x_1, x_2, x_3], axis=1)        # (B, 192)
    return fc_head(xcat, params)                           # (B, 1)


# ----------------------------------------------------------------------------
# Synthetic data + run
# ----------------------------------------------------------------------------
if __name__ == "__main__":
    B = 2                      # graphs
    N, E, NF = 12, 24, 8       # nodes / edges / node features
    N2, E2 = 10, 20            # 2-tuples
    N3, E3 = 8, 16             # 3-tuples
    NUM_I_2, NUM_I_3 = 6, 9
    EDGE_ATTR_DIM = 5

    key = jax.random.PRNGKey(0)
    ks = jax.random.split(key, 12)

    data = {
        "num_graphs": B,
        "x": jax.random.normal(ks[0], (N, NF), jnp.float32),
        "edge_index": jax.random.randint(ks[1], (2, E), 0, N),
        "edge_attr": jax.random.uniform(ks[2], (E, EDGE_ATTR_DIM), jnp.float32),
        "batch": jnp.repeat(jnp.arange(B), N // B),
        "iso_type_2": jax.random.randint(ks[3], (N2,), 0, NUM_I_2),
        "iso_type_3": jax.random.randint(ks[4], (N3,), 0, NUM_I_3),
        "edge_index_2": jax.random.randint(ks[5], (2, E2), 0, N2),
        "edge_index_3": jax.random.randint(ks[6], (2, E3), 0, N3),
        "assignment_index_2": jnp.stack(
            [jax.random.randint(ks[7], (2 * N2,), 0, N),
             jnp.repeat(jnp.arange(N2), 2)]),
        "assignment_index_3": jnp.stack(
            [jax.random.randint(ks[8], (3 * N3,), 0, N),
             jnp.repeat(jnp.arange(N3), 3)]),
        "batch_2": jnp.repeat(jnp.arange(B), N2 // B),
        "batch_3": jnp.repeat(jnp.arange(B), N3 // B),
    }

    params = init_params(ks[9], NF, NUM_I_2, NUM_I_3, EDGE_ATTR_DIM)

    out = k123_gnn_forward(params, data)
    out = jax.block_until_ready(out)
    assert out.shape == (B, 1) and out.dtype == jnp.float32
    print("KERNEL_OK")
</pallas_src>

<mosaic_0001>
module attributes {stable_mosaic.version = 11 : i64} {
  func.func @_nnconv_edge_kernel(%arg0: i32, %arg1: memref<16x5xf32, #tpu.memory_space<vmem>>, %arg2: memref<16x8xf32, #tpu.memory_space<vmem>>, %arg3: memref<5x128xf32, #tpu.memory_space<vmem>>, %arg4: memref<1x128xf32, #tpu.memory_space<vmem>>, %arg5: memref<1024x128xbf16, #tpu.memory_space<vmem>>, %arg6: memref<8x128xf32, #tpu.memory_space<vmem>>, %arg7: memref<16x128xf32, #tpu.memory_space<vmem>>) attributes {dimension_semantics = [#tpu.dimension_semantics<parallel>], iteration_bounds = array<i64: 2>, scalar_prefetch = 0 : i64, scratch_operands = 0 : i64, tpu.core_type = #tpu.core_type<tc>, window_params = [{transform_indices = @transform_0, window_bounds = array<i64: 16, 5>}, {transform_indices = @transform_1, window_bounds = array<i64: 16, 8>}, {pipeline_mode = #tpu.pipeline_mode<synchronous>, transform_indices = @transform_2, window_bounds = array<i64: 5, 128>}, {pipeline_mode = #tpu.pipeline_mode<synchronous>, transform_indices = @transform_3, window_bounds = array<i64: 1, 128>}, {pipeline_mode = #tpu.pipeline_mode<synchronous>, transform_indices = @transform_4, window_bounds = array<i64: 1024, 128>}, {pipeline_mode = #tpu.pipeline_mode<synchronous>, transform_indices = @transform_5, window_bounds = array<i64: 8, 128>}, {transform_indices = @transform_6, window_bounds = array<i64: 16, 128>}]} {
    %c0 = arith.constant 0 : index
    %c0_0 = arith.constant 0 : index
    %0 = vector.load %arg1[%c0, %c0_0] : memref<16x5xf32, #tpu.memory_space<vmem>>, vector<16x5xf32>
    %c0_1 = arith.constant 0 : index
    %c0_2 = arith.constant 0 : index
    %1 = vector.load %arg3[%c0_1, %c0_2] : memref<5x128xf32, #tpu.memory_space<vmem>>, vector<5x128xf32>
    %cst = arith.constant dense<0.000000e+00> : vector<16x128xf32>
    %2 = tpu.matmul %0, %1, %cst {dimension_numbers = #tpu.dot_dimension_numbers<[1], [0], [0], [1], [0, 0, 1, 1], [], []>} : vector<16x5xf32>, vector<5x128xf32>, vector<16x128xf32> -> vector<16x128xf32>
    %c0_3 = arith.constant 0 : index
    %c0_4 = arith.constant 0 : index
    %3 = vector.load %arg4[%c0_3, %c0_4] : memref<1x128xf32, #tpu.memory_space<vmem>>, vector<1x128xf32>
    %4 = vector.broadcast %3 : vector<1x128xf32> to vector<16x128xf32>
    %5 = arith.addf %2, %4 : vector<16x128xf32>
    %cst_5 = arith.constant 0.000000e+00 : f32
    %6 = vector.broadcast %cst_5 : f32 to vector<16x128xf32>
    %7 = arith.maximumf %5, %6 : vector<16x128xf32>
    %c0_6 = arith.constant 0 : index
    %c0_7 = arith.constant 0 : index
    %8 = vector.load %arg2[%c0_6, %c0_7] : memref<16x8xf32, #tpu.memory_space<vmem>>, vector<16x8xf32>
    %c0_8 = arith.constant 0 : index
    %c0_9 = arith.constant 0 : index
    %9 = vector.load %arg6[%c0_8, %c0_9] : memref<8x128xf32, #tpu.memory_space<vmem>>, vector<8x128xf32>
    %cst_10 = arith.constant dense<0.000000e+00> : vector<16x128xf32>
    %10 = tpu.matmul %8, %9, %cst_10 {dimension_numbers = #tpu.dot_dimension_numbers<[1], [0], [0], [1], [0, 0, 1, 1], [], []>} : vector<16x8xf32>, vector<8x128xf32>, vector<16x128xf32> -> vector<16x128xf32>
    %11 = arith.truncf %8 : vector<16x8xf32> to vector<16x8xbf16>
    %12 = vector.shape_cast %11 : vector<16x8xbf16> to vector<16x8x1xbf16>
    %13 = arith.truncf %7 : vector<16x128xf32> to vector<16x128xbf16>
    %14 = vector.shape_cast %13 : vector<16x128xbf16> to vector<16x1x128xbf16>
    %15 = vector.broadcast %12 : vector<16x8x1xbf16> to vector<16x8x128xbf16>
    %16 = vector.broadcast %14 : vector<16x1x128xbf16> to vector<16x8x128xbf16>
    %17 = arith.mulf %15, %16 : vector<16x8x128xbf16>
    %18 = vector.shape_cast %17 : vector<16x8x128xbf16> to vector<16x1024xbf16>
    %c0_11 = arith.constant 0 : index
    %c0_12 = arith.constant 0 : index
    %19 = vector.load %arg5[%c0_11, %c0_12] : memref<1024x128xbf16, #tpu.memory_space<vmem>>, vector<1024x128xbf16>
    %cst_13 = arith.constant dense<0.000000e+00> : vector<16x128xf32>
    %20 = tpu.matmul %18, %19, %cst_13 {dimension_numbers = #tpu.dot_dimension_numbers<[1], [0], [0], [1], [0, 0, 1, 1], [], []>} : vector<16x1024xbf16>, vector<1024x128xbf16>, vector<16x128xf32> -> vector<16x128xf32>
    %21 = arith.addf %10, %20 : vector<16x128xf32>
    %c0_14 = arith.constant 0 : index
    %c0_15 = arith.constant 0 : index
    %22 = vector.load %arg7[%c0_14, %c0_15] : memref<16x128xf32, #tpu.memory_space<vmem>>, vector<16x128xf32>
    tpu.vector_store %arg7[%c0_14, %c0_15], %21 {strides = array<i32>} : memref<16x128xf32, #tpu.memory_space<vmem>>, vector<16x128xf32>,
    return
  }
  func.func @transform_0(%arg0: i32) -> (i32, i32) {
    %c0_i32 = arith.constant 0 : i32
    %c0_i32_0 = arith.constant 0 : i32
    return %arg0, %c0_i32 : i32, i32
  }
  func.func @transform_1(%arg0: i32) -> (i32, i32) {
    %c0_i32 = arith.constant 0 : i32
    %c0_i32_0 = arith.constant 0 : i32
    return %arg0, %c0_i32 : i32, i32
  }
  func.func @transform_2(%arg0: i32) -> (i32, i32) {
    %c0_i32 = arith.constant 0 : i32
    %c0_i32_0 = arith.constant 0 : i32
    %c0_i32_1 = arith.constant 0 : i32
    return %c0_i32, %c0_i32_0 : i32, i32
  }
  func.func @transform_3(%arg0: i32) -> (i32, i32) {
    %c0_i32 = arith.constant 0 : i32
    %c0_i32_0 = arith.constant 0 : i32
    %c0_i32_1 = arith.constant 0 : i32
    return %c0_i32, %c0_i32_0 : i32, i32
  }
  func.func @transform_4(%arg0: i32) -> (i32, i32) {
    %c0_i32 = arith.constant 0 : i32
    %c0_i32_0 = arith.constant 0 : i32
    %c0_i32_1 = arith.constant 0 : i32
    return %c0_i32, %c0_i32_0 : i32, i32
  }
  func.func @transform_5(%arg0: i32) -> (i32, i32) {
    %c0_i32 = arith.constant 0 : i32
    %c0_i32_0 = arith.constant 0 : i32
    %c0_i32_1 = arith.constant 0 : i32
    return %c0_i32, %c0_i32_0 : i32, i32
  }
  func.func @transform_6(%arg0: i32) -> (i32, i32) {
    %c0_i32 = arith.constant 0 : i32
    %c0_i32_0 = arith.constant 0 : i32
    return %arg0, %c0_i32 : i32, i32
  }
}

</mosaic_0001>

<bundles_post_ra>
// kernel: tpu_custom_call.1
= control target key start
LH: loop header
LB: loop body
LE: loop exit
PB: predicated region body
PF: predicated region fallthrough
CT: control target
= control target key end

     0   :  { %11 = vsyncpa [#allocation3], 0  ;;  %s2556_s0 = inlined_call_operand.vmem [shape: f32[32,5], index: 0, kind: input, shape index: {}]   ;;  %s2557_s1 = inlined_call_operand.vmem [shape: f32[32,8], index: 1, kind: input, shape index: {}]   ;;  %s2558_s2 = inlined_call_operand.vmem [shape: f32[5,128], index: 2, kind: input, shape index: {}]   ;;  %s2559_s3 = inlined_call_operand.vmem [shape: f32[1,128], index: 3, kind: input, shape index: {}]   ;;  %s2560_s4 = inlined_call_operand.hbm [shape: bf16[1024,128], index: 4, kind: input, shape index: {}]   ;;  %s2561_s5 = inlined_call_operand.vmem [shape: f32[8,128], index: 5, kind: input, shape index: {}]   ;;  %s2562_s6 = inlined_call_operand.hbm [shape: f32[32,128], index: 6, kind: output, shape index: {}]  }
   0x1   :  { %12 = vsyncpa [#allocation4], 0 }
   0x2   :  { %14 = vsyncpa [#allocation4 + $0x1], 0  ;;  %s2275_s21 = smov 0   ;;  %s2277_s22 = smov 0  }
   0x3   :  { %s2279_s23 = smov 0   ;;  %s2281_s24 = smov 0  }
   0x4 LB: > { %s2296_s25 = sadd.s32 4294967295, %s2229_s24   ;;  %s1814_s26 = sadd.s32 4294967294, %s2229_s24   ;;  %s2229_s24 = sphi %s2281_s24, %s2578_s24   ;;  %s2225_s23 = sphi %s2279_s23, %s2577_s23   ;;  %s2221_s22 = sphi %s2277_s22, %s2576_s22   ;;  %s2217_s21 = sphi %s2275_s21, %s2575_s21  }
   0x5   : > { %s2300_s27 = sadd.s32 1, %s2229_s24   ;;  %s163_s28 = sadd.s32 1, %s2225_s23 }
   0x6   : > { %s160_s29 = ssub.s32 %s2229_s24, %s2300_s27  ;;  %p173_p0 = scmp.ne.s32.totalorder %s2225_s23, %s2221_s22 }
   0x7   : > { %p161_p1 = scmp.eq.s32.totalorder %s160_s29, 0  ;;  %p174_p2 = scmp.eq.s32.totalorder %s2296_s25, 1 }
   0x8   : > { %p179_p3 = scmp.ne.s32.totalorder %s2221_s22, %s2217_s21  ;;  %p180_p4 = scmp.eq.s32.totalorder %s1814_s26, 1 }
   0x9   : > { %s2311_s30 = scalar_select %p161_p1, %s2225_s23, %s163_s28  }
   0xa   : > { %p2313_p5 = por %p174_p2, %p173_p0  ;;  %p2317_p6 = por %p180_p4, %p179_p3 }
   0xb   : > { %p1815_p7 = scmp.ge.s32.totalorder %s2229_s24, 1  ;;  %p187_p8 = scmp.lt.s32.totalorder %s2229_s24, 3 }
   0xc   : > { %s2566_s7 = scalar_select %p2313_p5, 1, 0 }
   0xd   : > { %s2567_s8 = scalar_select %p2317_p6, 1, 0 }
   0xe   : > { %p2563_p9 = scmp.eq.s32.totalorder %s2296_s25, 0  ;;  %p2324_p10 = pnand %p1815_p7, %p187_p8 }
   0xf   : > { %s2231_s10 = smov [#allocation2]   ;;  %s2135_s15 = scalar_lea.hbm %s2560_s4, 8192 }
  0x10   : > { %s2568_s9 = scalar_select %p2324_p10, 1, 0 }
  0x11   : > { %s205_s11 = sshll.u32 %s2231_s10, 4  ;;  %p2020_p11 = pneg %p2324_p10  ;;  %s206_s11 = int_to_ptr.vmem [resolvable:$true] %s205_s11 }
  0x12   : > { %p2136_p13 = scmp.ne.s32.totalorder %s2560_s4, %s2135_s15  ;;  %p2142_p3 = scmp.lt.u32.totalorder %s2135_s15, %s2560_s4 }
  0x13   : > { %p2332_p12 = pnand %p2563_p9, %p2020_p11 }
  0x15   : > { %p2137_p0 = pneg %p2332_p12 }
  0x17   : > { %p2138_p1 = pnand %p2137_p0, %p2136_p13 }
  0x19   : > { %p2139_p2 = pneg %p2138_p1 }
  0x1b   : > { %p2144_p4 = pnand %p2142_p3, %p2139_p2 }
  0x1d   : > { %2147 = shalt.err (!%p2144_p4)
}
  0x1e   : > { %s2148_s20 = scalar_lea.vmem %s206_s11, 8192  ;;  %p2156_p9 = scmp.lt.s32.totalorder %s206_s11, %s206_s11 }
  0x1f   : > { %p2149_p7 = scmp.ne.s32.totalorder %s206_s11, %s2148_s20  ;;  %p2157_p6 = scmp.lt.s32.totalorder %s2148_s20, %s2148_s20 }
  0x21   : > { %p2151_p8 = pnand %p2149_p7, %p2137_p0  ;;  %p2158_p5 = por %p2157_p6, %p2156_p9 }
  0x23   : > { %p2152_p11 = pneg %p2151_p8 }
  0x25   : > { %p2159_p10 = pnand %p2158_p5, %p2152_p11 }
  0x27   : > { %2162 = shalt.err (!%p2159_p10)
}
  0x28   : > { %s2232_s26 = smov 64   ;;  %s2233_s28 = smov 4  }
  0x29   : > { %2023 = dma.hbm_to_vmem [thread:$0]  (!%p2332_p12), %s2560_s4, 8192, %s206_s11, [#allocation3], %s2232_s26, %s2232_s26, %s2233_s28  }
  0x2a   : > { %p2570_p13 = scmp.ne.s32.totalorder %s2568_s9, 0 }
  0x2b   : > { %p2571_p1 = scmp.eq.s32.totalorder (!%p2570_p13), %s2296_s25, 0 }
  0x2c   : > { %242 = sbr.rel (%p2570_p13) target bundleno = 596 (0x254), region = 44 }
  0x33   : > { %2208 = dma.done.wait (%p2571_p1), [#allocation3], 8192   ;;  %p2572_p0 = pmov %p2571_p1 }
  0x34   : > { %s1821_s13 = sshll.u32 %s2296_s25, 1  ;;  %v396_v0 = vlaneseq  ;;  %vm308_vm0 = vcmask 1044480   ;;  %vm301_vm1 = vcmask 39936   ;;  %v293_v5 = vld [vmem:[%s2558_s2] sm:$0x1f]  ;;  %v2075_v39 = vld [vmem:[#allocation2 + $0x48] sm:$0xff]  }
  0x35   : > { %2210 = vsyncadd (%p2572_p0), [#allocation3], 4294959104  ;;  %p278_p5 = scmp.lt.s32.totalorder %s1821_s13, 3  ;;  %2004 = vmatprep.subr.msk.mxu0 %vm308_vm0, %v293_v5  ;;  %v2071_v35 = vld [vmem:[#allocation2 + $0x40] sm:$0xff]   ;;  %v2076_v40 = vld [vmem:[#allocation2 + $0xc8] sm:$0xff]   ;;  %vm1630_vm2 = vcmask 64512  }
  0x36   : > { %v2359_v1 = vshrl.u32 %v396_v0, 7  ;;  %2005 = vmatpush3.msk.msra.mxu0 %vm308_vm0, %v293_v5  ;;  %1913 = vmatprep.subr.bf16.mxu1 %v2071_v35  ;;  %v2072_v36 = vld [vmem:[#allocation2 + $0xc0] sm:$0xff]   ;;  %v2077_v41 = vld [vmem:[#allocation2 + $0x8] sm:$0xff]   ;;  %v2079_v43 = vld [vmem:[#allocation2 + $0x50] sm:$0xff]   ;;  %s274_s10 = sand.u32 1, %s2221_s22   ;;  %s1909_s14 = sshll.u32 %s2296_s25, 8 }
  0x37   : > { %s2580_s13 = smov (!%p278_p5, %s1821_s13), 3  ;;  %v2073_v37 = vld [vmem:[#allocation2] sm:$0xff]   ;;  %1935 = vmatprep.subr.bf16.mxu0 %v2072_v36  ;;  %v2078_v42 = vld [vmem:[#allocation2 + $0x88] sm:$0xff]   ;;  %v2080_v44 = vld [vmem:[#allocation2 + $0xd0] sm:$0xff]   ;;  %s2513_s16 = scalar_lea.hbm %s2562_s6, %s1909_s14 }
  0x38   : > { %s1822_s12 = sshll.u32 %s2580_s13, 3  ;;  %v2368_v2 = vsub.s32 0, %v2359_v1  ;;  %v415_v3 = vsub.s32 1, %v2359_v1  ;;  %v429_v4 = vsub.s32 2, %v2359_v1  ;;  %v443_v8 = vsub.s32 3, %v2359_v1  ;;  %v2074_v38 = vld [vmem:[#allocation2 + $0x80] sm:$0xff]   ;;  %1914 = vmatpush3.bf16.msra.mxu1 %v2073_v37 }
  0x39   : > { %s281_s9 = scalar_lea.vmem %s2556_s0, %s1822_s12  ;;  %s287_s17 = scalar_lea.vmem %s2557_s1, %s1822_s12  ;;  %v457_v9 = vsub.s32 4, %v2359_v1  ;;  %v471_v12 = vsub.s32 5, %v2359_v1  ;;  %v485_v13 = vsub.s32 6, %v2359_v1  ;;  %v499_v17 = vsub.s32 7, %v2359_v1  ;;  %1915 = vmatprep.subr.bf16.mxu1 %v2075_v39  ;;  %v2081_v45 = vld [vmem:[#allocation2 + $0x10] sm:$0xff]   ;;  %v2083_v47 = vld [vmem:[#allocation2 + $0x58] sm:$0xff]  }
  0x3a   : > { %v291_v6 = vld [vmem:[%s281_s9] sm:$0xff]  ;;  %v292_v7 = vld [vmem:[%s281_s9 + $0x8] sm:$0xff]  ;;  %v2082_v46 = vld [vmem:[#allocation2 + $0x90] sm:$0xff]   ;;  %s1820_s13 = sshll.u32 %s274_s10, 4  ;;  %p2573_p9 = scmp.ne.s32.totalorder %s2566_s7, 0 }
  0x3b   : > { %2006 = vmatprep.mubr.msk.f32.mxu0 %vm301_vm1, %v291_v6  ;;  %v2379_v10 = vld [vmem:[%s287_s17] sm:$0xff]  ;;  %v2381_v11 = vld [vmem:[%s287_s17 + $0x8] sm:$0xff]  ;;  %v2084_v48 = vld [vmem:[#allocation2 + $0xd8] sm:$0xff]   ;;  %s276_s12 = scalar_lea.vmem [#allocation5], %s1820_s13  ;;  %s2515_s17 = scalar_lea.sflag [#allocation4], %s274_s10 }
  0x3c   : > { %v392_v14 = vpack.c.bf16 %v2381_v11, %v2379_v10  ;;  %2007 = vmatmul.mubr.msk.f32.vlgmr.msra.gmra.mrb[0].mxu0 %vm301_vm1, %v292_v7  ;;  %1916 = vmatpush3.bf16.msra.mxu1 %v2077_v41  ;;  %v2085_v49 = vld [vmem:[#allocation2 + $0x18] sm:$0xff]   ;;  %v2087_v51 = vld [vmem:[#allocation2 + $0x60] sm:$0xff]   ;;  %v2091_v55 = vld [vmem:[#allocation2 + $0x68] sm:$0xff]   ;;  %v2234_v7 = vmov 1966171168   ;;  %s1728_s11 = sshll.u32 %s276_s12, 4  ;;  %s2508_s11 = int_to_ptr.vmem [resolvable:$true] %s1728_s11 }
  0x3d   : > { %1936 = vmatpush3.bf16.msra.mxu0 %v2074_v38  ;;  %1917 = vmatprep.subr.bf16.mxu1 %v2079_v43  ;;  %v2086_v50 = vld [vmem:[#allocation2 + $0x98] sm:$0xff]   ;;  %v2088_v52 = vld [vmem:[#allocation2 + $0xe0] sm:$0xff]   ;;  %v2092_v56 = vld [vmem:[#allocation2 + $0xe8] sm:$0xff]   ;;  %s2163_s25 = scalar_lea.vmem %s2508_s11, 256  ;;  %s2237_s18 = smov [#allocation5]  }
  0x3e   : > { %v394_v15 = vpack.i.b16 %v392_v14, %v392_v14  ;;  %v403_v16 = vshrl.u32 %v392_v14, 16  ;;  %1937 = vmatprep.subr.bf16.mxu0 %v2076_v40  ;;  %v2089_v53 = vld [vmem:[#allocation2 + $0x20] sm:$0xff]   ;;  %v2093_v57 = vld [vmem:[#allocation2 + $0x28] sm:$0xff]   ;;  %v2095_v59 = vld [vmem:[#allocation2 + $0x70] sm:$0xff]   ;;  %p2164_p6 = scmp.ne.s32.totalorder %s2508_s11, %s2163_s25  ;;  %s2167_s19 = sshll.u32 %s2237_s18, 4  ;;  %s2168_s19 = int_to_ptr.vmem [resolvable:$false] %s2167_s19 }
  0x3f   : > { %v2090_v54 = vld [vmem:[#allocation2 + $0xa0] sm:$0xff]   ;;  %v2094_v58 = vld [vmem:[#allocation2 + $0xa8] sm:$0xff]   ;;  %v2096_v60 = vld [vmem:[#allocation2 + $0xf0] sm:$0xff]   ;;  %s2169_s20 = scalar_lea.vmem %s2168_s19, 512  ;;  %p2170_p2 = scmp.lt.s32.totalorder %s2508_s11, %s2168_s19 }
  0x40   : > { %v404_v18 = vpack.i.b16 %v403_v16, %v403_v16  ;;  %v399_v19 = vrot.slane %v394_v15, %v2368_v2  ;;  %v416_v20 = vrot.slane %v394_v15, %v415_v3  ;;  %v430_v21 = vrot.slane %v394_v15, %v429_v4  ;;  %1918 = vmatpush3.bf16.msra.mxu1 %v2081_v45  ;;  %v2097_v61 = vld [vmem:[#allocation2 + $0x30] sm:$0xff]   ;;  %v2099_v63 = vld [vmem:[#allocation2 + $0x78] sm:$0xff]   ;;  %v2103_v5 = vld [vmem:[#allocation2 + $0x140] sm:$0xff]   ;;  %p2165_p10 = pnand %p2164_p6, %p2573_p9  ;;  %p2171_p3 = scmp.lt.s32.totalorder %s2169_s20, %s2163_s25 }
  0x41   : > { %v444_v23 = vrot.slane %v394_v15, %v443_v8  ;;  %v458_v25 = vrot.slane %v394_v15, %v457_v9  ;;  %v472_v29 = vrot.slane %v394_v15, %v471_v12  ;;  %v486_v31 = vrot.slane %v394_v15, %v485_v13  ;;  %1938 = vmatpush3.bf16.msra.mxu0 %v2078_v42  ;;  %v2098_v62 = vld [vmem:[#allocation2 + $0xb0] sm:$0xff]   ;;  %v2100_v0 = vld [vmem:[#allocation2 + $0xf8] sm:$0xff]   ;;  %v2104_v6 = vld [vmem:[#allocation2 + $0x1c0] sm:$0xff]  }
  0x42   : > { %401 = vbcast.lane.c.b16.xlu0 %v399_v19, 256  ;;  %418 = vbcast.lane.c.b16.xlu1 %v416_v20, 256  ;;  %v423_v22 = vrot.slane %v404_v18, %v415_v3  ;;  %v437_v24 = vrot.slane %v404_v18, %v429_v4  ;;  %v451_v26 = vrot.slane %v404_v18, %v443_v8  ;;  %v2101_v3 = vld [vmem:[#allocation2 + $0x38] sm:$0xff]   ;;  %v515_v8 = vunpack.c.l.s4 %v2234_v7  ;;  %p2166_p12 = pneg %p2165_p10  ;;  %p2172_p4 = por %p2171_p3, %p2170_p2 }
  0x43   : > { %v409_v27 = vrot.slane %v404_v18, %v2368_v2  ;;  %v465_v28 = vrot.slane %v404_v18, %v457_v9  ;;  %v479_v30 = vrot.slane %v404_v18, %v471_v12  ;;  %v493_v32 = vrot.slane %v404_v18, %v485_v13  ;;  %1939 = vmatprep.subr.bf16.mxu0 %v2080_v44  ;;  %v2102_v4 = vld [vmem:[#allocation2 + $0xb8] sm:$0xff]   ;;  %v1825_v12 = vld [vmem:[%s2559_s3] ss:$0 sm:$0xff] }
  0x44   : > { %v500_v33 = vrot.slane %v394_v15, %v499_v17  ;;  %v507_v34 = vrot.slane %v404_v18, %v499_v17  ;;  %1919 = vmatprep.subr.bf16.mxu1 %v2083_v47  ;;  %v516_v15 = vunpack.c.0.s8 %v515_v8  ;;  %v2235_v47 = vmov 1983009808   ;;  %p2173_p7 = pnand %p2172_p4, %p2166_p12 }
  0x45   : > { %1940 = vmatpush3.bf16.msra.mxu0 %v2082_v46  ;;  %1920 = vmatpush3.bf16.msra.mxu1 %v2085_v49 }
  0x46   : > { %432 = vbcast.lane.c.b16.xlu0 %v430_v21, 256  ;;  %425 = vbcast.lane.c.b16.xlu1 %v423_v22, 256  ;;  %v519_v21 = vsub.s32 %v516_v15, %v2359_v1  ;;  %v2236_v15 = vmov 1934713408  }
  0x47   : > { %1941 = vmatprep.subr.bf16.mxu0 %v2084_v48  ;;  %1921 = vmatprep.subr.bf16.mxu1 %v2087_v51  ;;  %v788_v48 = vunpack.c.l.s4 %v2235_v47 }
  0x49   : > { %1942 = vmatpush3.bf16.msra.mxu0 %v2086_v50  ;;  %1922 = vmatpush3.bf16.msra.mxu1 %v2089_v53 }
  0x4a   : > { %446 = vbcast.lane.c.b16.xlu0 %v444_v23, 256  ;;  %439 = vbcast.lane.c.b16.xlu1 %v437_v24, 256 }
  0x4b   : > { %1943 = vmatprep.subr.bf16.mxu0 %v2088_v52  ;;  %1923 = vmatprep.subr.bf16.mxu1 %v2091_v55 }
  0x4d   : > { %1944 = vmatpush3.bf16.msra.mxu0 %v2090_v54  ;;  %1924 = vmatpush3.bf16.msra.mxu1 %v2093_v57 }
  0x4e   : > { %460 = vbcast.lane.c.b16.xlu0 %v458_v25, 256  ;;  %453 = vbcast.lane.c.b16.xlu1 %v451_v26, 256 }
  0x4f   : > { %1945 = vmatprep.subr.bf16.mxu0 %v2092_v56  ;;  %1925 = vmatprep.subr.bf16.mxu1 %v2095_v59 }
  0x51   : > { %1946 = vmatpush3.bf16.msra.mxu0 %v2094_v58  ;;  %1926 = vmatpush3.bf16.msra.mxu1 %v2097_v61 }
  0x52   : > { %411 = vbcast.lane.c.b16.xlu0 %v409_v27, 256  ;;  %467 = vbcast.lane.c.b16.xlu1 %v465_v28, 256 }
  0x53   : > { %1947 = vmatprep.subr.bf16.mxu0 %v2096_v60  ;;  %1927 = vmatprep.subr.bf16.mxu1 %v2099_v63 }
  0x55   : > { %1948 = vmatpush3.bf16.msra.mxu0 %v2098_v62  ;;  %1928 = vmatpush3.bf16.msra.mxu1 %v2101_v3  ;;  %v789_v62 = vunpack.c.0.s8 %v788_v48 }
  0x56   : > { %474 = vbcast.lane.c.b16.xlu0 %v472_v29, 256  ;;  %481 = vbcast.lane.c.b16.xlu1 %v479_v30, 256 }
  0x57   : > { %1949 = vmatprep.subr.bf16.mxu0 %v2100_v0  ;;  %1957 = vmatprep.subr.bf16.mxu1 %v2103_v5 }
  0x59   : > { %1950 = vmatpush3.bf16.msra.mxu0 %v2102_v4 }
  0x5a   : > { %488 = vbcast.lane.c.b16.xlu0 %v486_v31, 256  ;;  %495 = vbcast.lane.c.b16.xlu1 %v493_v32, 256 }
  0x5b   : > { %1979 = vmatprep.subr.bf16.mxu0 %v2104_v6 }
  0x5e   : > { %502 = vbcast.lane.c.b16.xlu0 %v500_v33, 256  ;;  %509 = vbcast.lane.c.b16.xlu1 %v507_v34, 256 }
  0xb4   : > { %v2392_v9 = vpop.permute.xlu0 %401  ;;  %v2397_v13 = vpop.permute.xlu1 %418 }
  0xb8   : > { %v2399_v19 = vpop.permute.xlu0 %432  ;;  %v2402_v23 = vpop.permute.xlu1 %425 }
  0xbc   : > { %v2404_v27 = vpop.permute.xlu0 %446  ;;  %v2406_v31 = vpop.permute.xlu1 %439 }
  0xc0   : > { %v2408_v38 = vpop.permute.xlu0 %460  ;;  %v2410_v43 = vpop.permute.xlu1 %453 }
  0xc4   : > { %v2416_v59 = vpop.permute.xlu0 %411  ;;  %v2422_v6 = vpop.permute.xlu1 %467 }
 0x10f   : > { %v2008_v14 = vpop.f32.mrb[0].mxu0 }
 0x110   : > { %v384_v16 = vadd.f32 %v2008_v14, %v1825_v12  ;;  %v378_v17 = vpop.f32.mrb[1].mxu0 }
 0x111   : > { %v379_v18 = vadd.f32 %v1825_v12, %v378_v17 }
 0x112   : > { %v388_v20 = vmax.f32 %v384_v16, 0.0  ;;  %v2424_v16 = vunpack.c.l.s4 %v2236_v15 }
 0x113   : > { %v387_v22 = vmax.f32 %v379_v18, 0.0 }
 0x114   : > { %v1829_v24 = vpack.c.bf16 %v388_v20, %v388_v20 }
 0x115   : > { %v511_v25 = vpack.c.bf16 %v388_v20, %v387_v22  ;;  %v2428_v22 = vsub.s32 %v789_v62, %v2359_v1 }
 0x116   : > { %v527_v28 = vrot.slane %v1829_v24, %v519_v21 }
 0x117   : > { %v520_v26 = vrot.slane %v511_v25, %v519_v21 }
 0x118   : > { %v543_v34 = vrot.slane %v527_v28, %v519_v21  ;;  %v529_v40 = vcombine.high %v527_v28, %v527_v28 }
 0x119   : > { %v528_v29 = vcombine.high %v520_v26, %v520_v26  ;;  %v536_v30 = vrot.slane %v520_v26, %v519_v21 }
 0x11a   : > { %v1834_v50 = vpack.i.b16 %v543_v34, %v543_v34  ;;  %v557_v55 = vrot.slane %v529_v40, %v519_v21  ;;  %v571_v57 = vunpack.i.h.s16 %v543_v34  ;;  %v559_v7 = vcombine.high %v543_v34, %v543_v34 }
 0x11b   : > { %v550_v32 = vrot.slane %v528_v29, %v519_v21  ;;  %v558_v33 = vcombine.high %v536_v30, %v536_v30  ;;  %v563_v45 = vunpack.i.h.s16 %v536_v30  ;;  %v1830_v46 = vpack.i.b16 %v536_v30, %v536_v30  ;;  %v2432_v30 = vpop.permute.xlu0 %474 }
 0x11c   : > { %v629_v0 = vrot.slane %v1834_v50, %v2368_v2  ;;  %v587_v12 = vpack.i.b16 %v571_v57, %v571_v57  ;;  %v573_v14 = vunpack.i.h.s16 %v557_v55  ;;  %v1835_v20 = vpack.i.b16 %v557_v55, %v557_v55 }
 0x11d   : > { %v560_v35 = vcombine.high %v550_v32, %v550_v32  ;;  %v1831_v36 = vpack.i.b16 %v550_v32, %v550_v32  ;;  %v567_v37 = vunpack.i.h.s16 %v558_v33  ;;  %v565_v39 = vunpack.i.h.s16 %v550_v32 }
 0x11e   : > { %v1832_v41 = vpack.i.b16 %v558_v33, %v558_v33  ;;  %v579_v60 = vpack.i.b16 %v563_v45, %v563_v45  ;;  %v597_v61 = vrot.slane %v1830_v46, %v2368_v2  ;;  %v715_v25 = vpack.i.b16 %v629_v0, %v629_v0 }
 0x11f   : > { %v1833_v42 = vpack.i.b16 %v560_v35, %v560_v35  ;;  %v569_v44 = vunpack.i.h.s16 %v560_v35  ;;  %v605_v49 = vrot.slane %v1831_v36, %v2368_v2  ;;  %v583_v52 = vpack.i.b16 %v567_v37, %v567_v37 }
 0x120   : > { %v581_v53 = vpack.i.b16 %v565_v39, %v565_v39  ;;  %v613_v56 = vrot.slane %v1832_v41, %v2368_v2  ;;  %v601_v18 = vrot.slane %v579_v60, %v2368_v2  ;;  %v659_v21 = vpack.i.b16 %v597_v61, %v597_v61  ;;  %v2438_v41 = vpop.permute.xlu1 %481  ;;  %v489_v61 = vpop.permute.xlu0 %488 }
 0x121   : > { %v621_v51 = vrot.slane %v1833_v42, %v2368_v2  ;;  %v585_v54 = vpack.i.b16 %v569_v44, %v569_v44  ;;  %v673_v63 = vpack.i.b16 %v605_v49, %v605_v49  ;;  %v617_v4 = vrot.slane %v583_v52, %v2368_v2 }
 0x122   : > { %v609_v5 = vrot.slane %v581_v53, %v2368_v2  ;;  %v687_v8 = vpack.i.b16 %v613_v56, %v613_v56  ;;  %v1836_v32 = vpack.i.b16 %v559_v7, %v559_v7  ;;  %v633_v34 = vrot.slane %v587_v12, %v2368_v2 }
 0x123   : > { %v625_v58 = vrot.slane %v585_v54, %v2368_v2  ;;  %v701_v3 = vpack.i.b16 %v621_v51, %v621_v51  ;;  %v678_v24 = vrot.slane %v673_v63, %v2368_v2  ;;  %v694_v28 = vpack.i.b16 %v617_v4, %v617_v4 }
 0x124   : > { %v680_v29 = vpack.i.b16 %v609_v5, %v609_v5  ;;  %v692_v33 = vrot.slane %v687_v8, %v2368_v2  ;;  %v589_v35 = vpack.i.b16 %v573_v14, %v573_v14  ;;  %v575_v36 = vunpack.i.h.s16 %v559_v7 }
 0x125   : > { %v708_v17 = vpack.i.b16 %v625_v58, %v625_v58  ;;  %v706_v26 = vrot.slane %v701_v3, %v2368_v2  ;;  %v666_v39 = vpack.i.b16 %v601_v18, %v601_v18  ;;  %v637_v40 = vrot.slane %v1835_v20, %v2368_v2 }
 0x126   : > { %v645_v42 = vrot.slane %v1836_v32, %v2368_v2  ;;  %v664_v44 = vrot.slane %v659_v21, %v2368_v2  ;;  %v772_v45 = vmul.bf16 %v678_v24, %v2397_v13  ;;  %v720_v46 = vrot.slane %v715_v25, %v2368_v2 }
 0x127   : > { %v713_v37 = vrot.slane %v708_v17, %v2368_v2  ;;  %v591_v47 = vpack.i.b16 %v575_v36, %v575_v36  ;;  %v776_v48 = vmul.bf16 %v706_v26, %v2404_v27  ;;  %v699_v49 = vrot.slane %v694_v28, %v2368_v2  ;;  %v503_v28 = vpop.permute.xlu0 %502 }
 0x128   : > { %v685_v50 = vrot.slane %v680_v29, %v2368_v2  ;;  %v743_v51 = vpack.i.b16 %v645_v42, %v645_v42  ;;  %v774_v52 = vmul.bf16 %v692_v33, %v2399_v19  ;;  %v641_v53 = vrot.slane %v589_v35, %v2368_v2 }
 0x129   : > { %v649_v54 = vrot.slane %v591_v47, %v2368_v2  ;;  %v561_v56 = vcombine.high %v557_v55, %v557_v55  ;;  %v777_v57 = vmul.bf16 %v713_v37, %v2410_v43  ;;  %v671_v13 = vrot.slane %v666_v39, %v2368_v2  ;;  %v496_v55 = vpop.permute.xlu1 %495 }
 0x12a   : > { %v722_v58 = vpack.i.b16 %v633_v34, %v633_v34  ;;  %v729_v60 = vpack.i.b16 %v637_v40, %v637_v40  ;;  %v748_v27 = vrot.slane %v743_v51, %v2368_v2  ;;  %v770_v3 = vmul.bf16 %v664_v44, %v2392_v9 }
 0x12b   : > { %v750_v62 = vpack.i.b16 %v649_v54, %v649_v54  ;;  %v1837_v63 = vpack.i.b16 %v561_v56, %v561_v56  ;;  %v577_v0 = vunpack.i.h.s16 %v561_v56  ;;  %v794_v19 = vcombine.low %v772_v45, %v776_v48 }
 0x12c   : > { %v775_v4 = vmul.bf16 %v699_v49, %v2406_v31  ;;  %v773_v5 = vmul.bf16 %v685_v50, %v2402_v23  ;;  %v736_v7 = vpack.i.b16 %v641_v53, %v641_v53  ;;  %v786_v14 = vcombine.low %v770_v3, %v774_v52 }
 0x12d   : > { %v755_v43 = vrot.slane %v750_v62, %v2368_v2  ;;  %v653_v8 = vrot.slane %v1837_v63, %v2368_v2  ;;  %v593_v12 = vpack.i.b16 %v577_v0, %v577_v0  ;;  %v771_v17 = vmul.bf16 %v671_v13, %v2416_v59  ;;  %v510_v37 = vpop.permute.xlu1 %509 }
 0x12e   : > { %v862_v15 = vcombine.low %v773_v5, %v777_v57  ;;  %v727_v18 = vrot.slane %v722_v58, %v2368_v2  ;;  %v734_v9 = vrot.slane %v729_v60, %v2368_v2  ;;  %v782_v20 = vmul.bf16 %v748_v27, %v489_v61 }
 0x12f   : > { %v757_v21 = vpack.i.b16 %v653_v8, %v653_v8  ;;  %v657_v31 = vrot.slane %v593_v12, %v2368_v2  ;;  %v822_v23 = vunpack.c.0.s8 %v2424_v16  ;;  %v801_v24 = vrot.slane %v794_v19, %v2428_v22 }
 0x130   : > { %v778_v25 = vmul.bf16 %v720_v46, %v2408_v38  ;;  %v854_v26 = vcombine.low %v771_v17, %v775_v4  ;;  %v741_v29 = vrot.slane %v736_v7, %v2368_v2  ;;  %v783_v32 = vmul.bf16 %v755_v43, %v496_v55 }
 0x131   : > { %v762_v59 = vrot.slane %v757_v21, %v2368_v2  ;;  %v764_v33 = vpack.i.b16 %v657_v31, %v657_v31  ;;  %v793_v34 = vrot.slane %v786_v14, %v2428_v22  ;;  %v869_v35 = vrot.slane %v862_v15, %v2428_v22 }
 0x132   : > { %v779_v36 = vmul.bf16 %v727_v18, %v2422_v6  ;;  %v780_v16 = vmul.bf16 %v734_v9, %v2432_v30  ;;  %v802_v39 = vcombine.low %v778_v25, %v782_v20  ;;  %v825_v42 = vsub.s32 %v822_v23, %v2359_v1 }
 0x133   : > { %v784_v40 = vmul.bf16 %v762_v59, %v503_v28  ;;  %v769_v38 = vrot.slane %v764_v33, %v2368_v2  ;;  %v818_v44 = vcombine.low %v793_v34, %v801_v24  ;;  %v861_v45 = vrot.slane %v854_v26, %v2428_v22  ;;  %v2105_v28 = vld [vmem:[#allocation2 + $0x100] sm:$0xff]   ;;  %v2107_v33 = vld [vmem:[#allocation2 + $0x148] sm:$0xff]  }
 0x134   : > { %v781_v46 = vmul.bf16 %v741_v29, %v2438_v41  ;;  %v870_v47 = vcombine.low %v779_v36, %v783_v32  ;;  %v819_v50 = vcombine.high %v793_v34, %v801_v24  ;;  %v809_v6 = vrot.slane %v802_v39, %v2428_v22  ;;  %v2106_v29 = vld [vmem:[#allocation2 + $0x180] sm:$0xff]   ;;  %v2108_v34 = vld [vmem:[#allocation2 + $0x1c8] sm:$0xff]   ;;  %v2113_v39 = vld [vmem:[#allocation2 + $0x110] sm:$0xff]  }
 0x135   : > { %v810_v48 = vcombine.low %v780_v16, %v784_v40  ;;  %v785_v49 = vmul.bf16 %v769_v38, %v510_v37  ;;  %v886_v51 = vcombine.low %v861_v45, %v869_v35  ;;  %v887_v53 = vcombine.high %v861_v45, %v869_v35  ;;  %v2109_v35 = vld [vmem:[#allocation2 + $0x108] sm:$0xff]   ;;  %v2111_v37 = vld [vmem:[#allocation2 + $0x150] sm:$0xff]   ;;  %v2115_v38 = vld [vmem:[#allocation2 + $0x158] sm:$0xff]  }
 0x136   : > { %v826_v54 = vrot.slane %v818_v44, %v825_v42  ;;  %v877_v2 = vrot.slane %v870_v47, %v2428_v22  ;;  %v833_v13 = vrot.slane %v819_v50, %v825_v42  ;;  %v2110_v36 = vld [vmem:[#allocation2 + $0x188] sm:$0xff]   ;;  %v2112_v16 = vld [vmem:[#allocation2 + $0x1d0] sm:$0xff]   ;;  %v2117_v44 = vld [vmem:[#allocation2 + $0x118] sm:$0xff]  }
 0x137   : > { %v817_v30 = vrot.slane %v810_v48, %v2428_v22  ;;  %v878_v52 = vcombine.low %v781_v46, %v785_v49  ;;  %v894_v41 = vrot.slane %v886_v51, %v825_v42  ;;  %v901_v62 = vrot.slane %v887_v53, %v825_v42  ;;  %v2114_v40 = vld [vmem:[#allocation2 + $0x190] sm:$0xff]   ;;  %v2118_v45 = vld [vmem:[#allocation2 + $0x198] sm:$0xff]   ;;  %v2119_v46 = vld [vmem:[#allocation2 + $0x160] sm:$0xff]  }
 0x138   : > { %v2120_v47 = vld [vmem:[#allocation2 + $0x1e0] sm:$0xff]   ;;  %v2123_v50 = vld [vmem:[#allocation2 + $0x168] sm:$0xff]   ;;  %v2128_v53 = vld [vmem:[#allocation2 + $0x1f0] sm:$0xff]  }
 0x139   : > { %v834_v1 = vcombine.low %v809_v6, %v817_v30  ;;  %v835_v56 = vcombine.high %v809_v6, %v817_v30  ;;  %v885_v57 = vrot.slane %v878_v52, %v2428_v22  ;;  %v2121_v48 = vld [vmem:[#allocation2 + $0x120] sm:$0xff]   ;;  %v2124_v51 = vld [vmem:[#allocation2 + $0x1e8] sm:$0xff]   ;;  %v2127_v52 = vld [vmem:[#allocation2 + $0x170] sm:$0xff]  }
 0x13a   : > { %v2122_v49 = vld [vmem:[#allocation2 + $0x1a0] sm:$0xff]   ;;  %v2125_v6 = vld [vmem:[#allocation2 + $0x128] sm:$0xff]  }
 0x13b   : > { %v849_v58 = vrot.slane %v835_v56, %v825_v42  ;;  %v902_v60 = vcombine.low %v877_v2, %v885_v57  ;;  %v903_v61 = vcombine.high %v877_v2, %v885_v57  ;;  %v842_v27 = vrot.slane %v834_v1, %v825_v42  ;;  %v2126_v30 = vld [vmem:[#allocation2 + $0x1a8] sm:$0xff]   ;;  %v2130_v2 = vld [vmem:[#allocation2 + $0x1b0] sm:$0xff]   ;;  %v2131_v1 = vld [vmem:[#allocation2 + $0x178] sm:$0xff]  }
 0x13c   : > { %v2132_v56 = vld [vmem:[#allocation2 + $0x1f8] sm:$0xff]  }
 0x13d   : > { %v917_v63 = vrot.slane %v903_v61, %v825_v42  ;;  %v850_v0 = vcombine.low %v826_v54, %v842_v27  ;;  %v910_v3 = vrot.slane %v902_v60, %v825_v42  ;;  %v851_v19 = vcombine.high %v826_v54, %v842_v27  ;;  %v2116_v42 = vld [vmem:[#allocation2 + $0x1d8] sm:$0xff]   ;;  %v2129_v54 = vld [vmem:[#allocation2 + $0x130] sm:$0xff]  }
 0x13e   : > { %v2479_v4 = vcombine.low %v833_v13, %v849_v58  ;;  %v2481_v5 = vcombine.high %v833_v13, %v849_v58  ;;  %v2133_v57 = vld [vmem:[#allocation2 + $0x138] sm:$0xff]  }
 0x13f   : > { %v918_v55 = vcombine.low %v894_v41, %v910_v3  ;;  %v926_v7 = vshrl.u32 %v850_v0, 16  ;;  %v919_v43 = vcombine.high %v894_v41, %v910_v3  ;;  %v934_v8 = vshrl.u32 %v851_v19, 16  ;;  %v2134_v13 = vld [vmem:[#allocation2 + $0x1b8] sm:$0xff]   ;;  %v391_v41 = vld [vmem:[%s2561_s5] sm:$0xff] }
 0x140   : > { %v2483_v22 = vcombine.low %v901_v62, %v917_v63  ;;  %v942_v12 = vshrl.u32 %v2479_v4, 16  ;;  %v2486_v14 = vcombine.high %v901_v62, %v917_v63  ;;  %v950_v15 = vshrl.u32 %v2481_v5, 16 }
 0x141   : > { %v927_v17 = vshrl.u32 %v918_v55, 16  ;;  %v935_v18 = vshrl.u32 %v919_v43, 16  ;;  %v924_v9 = vpack.i.b16 %v918_v55, %v850_v0  ;;  %v932_v20 = vpack.i.b16 %v919_v43, %v851_v19 }
 0x142   : > { %v943_v21 = vshrl.u32 %v2483_v22, 16  ;;  %v951_v31 = vshrl.u32 %v2486_v14, 16  ;;  %v940_v23 = vpack.i.b16 %v2483_v22, %v2479_v4  ;;  %v948_v24 = vpack.i.b16 %v2486_v14, %v2481_v5 }
 0x143   : > { %v928_v25 = vpack.i.b16 %v927_v17, %v926_v7  ;;  %v936_v26 = vpack.i.b16 %v935_v18, %v934_v8 }
 0x144   : > { %v944_v32 = vpack.i.b16 %v943_v21, %v942_v12  ;;  %v952_v59 = vpack.i.b16 %v951_v31, %v950_v15 }
 0x145   : > { %1498 = vmatprep.mubr.bf16.mxu1 %v928_v25  ;;  %1539 = vmatprep.mubr.bf16.mxu0 %v936_v26 }
 0x146   : > { %1499 = vmatmul.mubr.bf16.vlgmr.msra.gmra.mrb[0].mxu1 %v924_v9  ;;  %1540 = vmatmul.mubr.bf16.vlgmr.msra.gmra.mrb[4].mxu0 %v932_v20 }
 0x147   : > { %1958 = vmatpush3.bf16.msra.mxu1 %v2105_v28  ;;  %1980 = vmatpush3.bf16.msra.mxu0 %v2106_v29 }
 0x148   : > { %1580 = vmatprep.mubr.bf16.mxu1 %v944_v32  ;;  %1621 = vmatprep.mubr.bf16.mxu0 %v952_v59 }
 0x149   : > { %1959 = vmatprep.subr.bf16.mxu1 %v2107_v33  ;;  %1981 = vmatprep.subr.bf16.mxu0 %v2108_v34 }
 0x14b   : > { %1960 = vmatpush3.bf16.msra.mxu1 %v2109_v35  ;;  %1982 = vmatpush3.bf16.msra.mxu0 %v2110_v36 }
 0x14c   : > { %1961 = vmatprep.subr.bf16.mxu1 %v2111_v37  ;;  %1983 = vmatprep.subr.bf16.mxu0 %v2112_v16 }
 0x14f   : > { %1962 = vmatpush3.bf16.msra.mxu1 %v2113_v39  ;;  %1984 = vmatpush3.bf16.msra.mxu0 %v2114_v40 }
 0x150   : > { %1963 = vmatprep.subr.bf16.mxu1 %v2115_v38  ;;  %1985 = vmatprep.subr.bf16.mxu0 %v2116_v42 }
 0x153   : > { %1964 = vmatpush3.bf16.msra.mxu1 %v2117_v44  ;;  %1986 = vmatpush3.bf16.msra.mxu0 %v2118_v45 }
 0x154   : > { %1965 = vmatprep.subr.bf16.mxu1 %v2119_v46  ;;  %1987 = vmatprep.subr.bf16.mxu0 %v2120_v47 }
 0x157   : > { %1966 = vmatpush3.bf16.msra.mxu1 %v2121_v48  ;;  %1988 = vmatpush3.bf16.msra.mxu0 %v2122_v49 }
 0x158   : > { %1967 = vmatprep.subr.bf16.mxu1 %v2123_v50  ;;  %1989 = vmatprep.subr.bf16.mxu0 %v2124_v51 }
 0x15b   : > { %1968 = vmatpush3.bf16.msra.mxu1 %v2125_v6  ;;  %1990 = vmatpush3.bf16.msra.mxu0 %v2126_v30 }
 0x15c   : > { %1969 = vmatprep.subr.bf16.mxu1 %v2127_v52  ;;  %1991 = vmatprep.subr.bf16.mxu0 %v2128_v53 }
 0x15f   : > { %1970 = vmatpush3.bf16.msra.mxu1 %v2129_v54  ;;  %1992 = vmatpush3.bf16.msra.mxu0 %v2130_v2 }
 0x160   : > { %1971 = vmatprep.subr.bf16.mxu1 %v2131_v1  ;;  %1993 = vmatprep.subr.bf16.mxu0 %v2132_v56 }
 0x163   : > { %1972 = vmatpush3.bf16.msra.mxu1 %v2133_v57  ;;  %1994 = vmatpush3.bf16.msra.mxu0 %v2134_v13 }
 0x164   : > { %2009 = vmatprep.subr.mxu1 %v391_v41 }
 0x166   : > { %1581 = vmatmul.mubr.bf16.vlgmr.msra.gmra.mrb[4].mxu1 %v940_v23  ;;  %1622 = vmatmul.mubr.bf16.vlgmr.msra.gmra.mrb[8].mxu0 %v948_v24 }
 0x167   : > { %2010 = vmatpush3.msra.mxu1 %v391_v41  ;;  %2011 = vmatprep.mubr.msk.f32.mxu1 %vm1630_vm2, %v2379_v10 }
 0x16e   : > { %2012 = vmatmul.mubr.msk.f32.vlgmr.msra.gmra.mrb[8].mxu1 %vm1630_vm2, %v2381_v11 }
 0x219   : > { %v1929_v58 = vpop.f32.mrb[0].mxu1  ;;  %v1951_v60 = vpop.f32.mrb[4].mxu0 }
 0x21a   : > { %v1930_v61 = vpop.f32.mrb[1].mxu1  ;;  %v1952_v27 = vpop.f32.mrb[5].mxu0 }
 0x21b   : > { %v1931_v62 = vadd.f32 %v1930_v61, %v1929_v58  ;;  %v1953_v63 = vadd.f32 %v1952_v27, %v1951_v60  ;;  %v1932_v0 = vpop.f32.mrb[2].mxu1  ;;  %v1954_v3 = vpop.f32.mrb[6].mxu0 }
 0x21c   : > { %v1933_v19 = vpop.f32.mrb[3].mxu1  ;;  %v1955_v4 = vpop.f32.mrb[7].mxu0 }
 0x21d   : > { %v1542_v55 = vadd.f32 %v1953_v63, %v1931_v62  ;;  %v1934_v7 = vadd.f32 %v1933_v19, %v1932_v0  ;;  %v1956_v5 = vadd.f32 %v1955_v4, %v1954_v3 }
 0x21f   : > { %v1545_v43 = vadd.f32 %v1956_v5, %v1934_v7 }
 0x239   : > { %v1973_v8 = vpop.f32.mrb[4].mxu1  ;;  %v1995_v10 = vpop.f32.mrb[8].mxu0 }
 0x23a   : > { %v1974_v11 = vpop.f32.mrb[5].mxu1  ;;  %v1996_v22 = vpop.f32.mrb[9].mxu0 }
 0x23b   : > { %v1975_v12 = vadd.f32 %v1974_v11, %v1973_v8  ;;  %v1997_v14 = vadd.f32 %v1996_v22, %v1995_v10  ;;  %v1976_v15 = vpop.f32.mrb[6].mxu1  ;;  %v1998_v17 = vpop.f32.mrb[10].mxu0 }
 0x23c   : > { %v1977_v18 = vpop.f32.mrb[7].mxu1  ;;  %v1999_v9 = vpop.f32.mrb[11].mxu0 }
 0x23d   : > { %v1583_v20 = vadd.f32 %v1975_v12, %v1542_v55  ;;  %v1978_v21 = vadd.f32 %v1977_v18, %v1976_v15  ;;  %v2000_v31 = vadd.f32 %v1999_v9, %v1998_v17 }
 0x23f   : > { %v1586_v23 = vadd.f32 %v1978_v21, %v1545_v43  ;;  %v1624_v24 = vadd.f32 %v1997_v14, %v1583_v20 }
 0x241   : > { %v1627_v25 = vadd.f32 %v2000_v31, %v1586_v23  ;;  %v2013_v26 = vpop.f32.mrb[8].mxu1 }
 0x242   : > { %v1703_v28 = vpop.f32.mrb[9].mxu1 }
 0x243   : > { %v1709_v29 = vadd.f32 %v2013_v26, %v1627_v25  ;;  %v1704_v32 = vadd.f32 %v1703_v28, %v1624_v24 }
 0x245   : > { %1713 = vst [vmem:[%s276_s12 + $0x8] sm:$0xff] %v1709_v29  ;;  %1712 = vst [vmem:[%s276_s12] sm:$0xff] %v1704_v32 }
 0x246   : > { %2176 = shalt.err (!%p2173_p7)
}
 0x247   : > { %s2177_s26 = scalar_lea.hbm %s2513_s16, 256  ;;  %s2181_s10 = scalar_lea.hbm %s2562_s6, 512 }
 0x248   : > { %p2178_p8 = scmp.ne.s32.totalorder %s2513_s16, %s2177_s26  ;;  %p2182_p1 = scmp.lt.u32.totalorder %s2513_s16, %s2562_s6 }
 0x249   : > { %p2183_p0 = scmp.lt.u32.totalorder %s2181_s10, %s2177_s26  ;;  %p2185_p6 = scmp.lt.u32.totalorder %s2177_s26, %s2513_s16 }
 0x24a   : > { %p2179_p11 = pnand %p2178_p8, %p2573_p9 }
 0x24b   : > { %p2184_p5 = por %p2183_p0, %p2182_p1 }
 0x24c   : > { %p2180_p13 = pneg %p2179_p11 }
 0x24d   : > { %p2186_p10 = por %p2185_p6, %p2184_p5 }
 0x24f   : > { %p2187_p12 = pnand %p2186_p10, %p2180_p13 }
 0x251   : > { %2190 = shalt.err (!%p2187_p12)
}
 0x252   : > { %s2238_s14 = smov 128   ;;  %s2239_s9 = smov 8  }
 0x253   : > { %2018 = dma.vmem_to_hbm [thread:$0]  (%p2573_p9), %s2508_s11, 256, %s2513_s16, %s2515_s17, %s2238_s14, %s2238_s14, %s2239_s9  }
 0x254 PF: > { %p2030_p2 = scmp.ge.s32.totalorder %s2229_s24, 2  ;;  %s1743_s15 = sand.u32 1, %s2217_s21  }
 0x255   : > { %p2574_p3 = scmp.ne.s32.totalorder %s2567_s8, 0  ;;  %s1744_s25 = scalar_lea.sflag [#allocation4], %s1743_s15 }
 0x257   : > { %p2025_p4 = pnand %p2030_p2, %p2574_p3 }
 0x259   : > { %2212 = dma.done.wait (!%p2025_p4), %s1744_s25, 256  }
 0x25a   : > { %2214 = vsyncadd (!%p2025_p4), %s1744_s25, 4294967040  ;;  %p17_p7 = scmp.ge.s32.totalorder %s2300_s27, 4   ;;  %s2575_s21 = smov %s2221_s22 }
 0x25b   : > { %s2576_s22 = smov %s2225_s23  ;;  %s2577_s23 = smov %s2311_s30 }
 0x25c   : > { %s2578_s24 = smov %s2300_s27  ;;  %19 = sbr.rel (!%p17_p7) target bundleno = 4 (0x4), region = 87 }
 0x263   :  { %1749 = vsyncpa [#allocation3], 1 }
 0x264   :  { %1751 = vsyncpa [#allocation3 + $0x1], 1 }
 0x265   :  { %1752 = vsyncpa [#allocation4], 1 }
 0x266   :  { %1754 = vsyncpa [#allocation4 + $0x1], 1 }

</bundles_post_ra>
